<compile_context>
chip_gen: v5e
topology: v5e:2x2
jax: 0.10.0
libtpu: 0.0.40
codegen_flags: <defaults>
</compile_context>

<pallas_src>
import functools

import jax
import jax.numpy as jnp
from jax.experimental import pallas as pl
from jax.experimental.pallas import tpu as pltpu


def _round_up(x, m):
    return (x + m - 1) // m * m


def _ln_normalize(x, eps):
    # Single-pass LayerNorm statistics: var = E[x^2] - E[x]^2 (one VPU pass).
    inv_d = 1.0 / x.shape[-1]
    mu = jnp.sum(x, axis=-1, keepdims=True) * inv_d
    msq = jnp.sum(x * x, axis=-1, keepdims=True) * inv_d
    var = jnp.maximum(msq - mu * mu, 0.0)
    return (x - mu) * jax.lax.rsqrt(var + eps)


# -----------------------------------------------------------------------------
# Fused kernel: LN(seq) + LN(state) -> proj -> 2 residual MLP blocks -> out
# (one row tile of the flattened token axis per grid step)
# -----------------------------------------------------------------------------
def _scpred_kernel(seq_ref, state_ref,
                   ws0_ref, wsi_ref, b0_ref,
                   w1_ref, b1_ref, w2_ref, b2_ref,
                   w3_ref, b3_ref, w4_ref, b4_ref,
                   wout_ref, bout_ref,
                   out_ref, *, eps):
    # bf16 MXU inputs, fp32 accumulation; precision pinned explicitly.
    def mm(a, w_ref):
        return jnp.dot(a.astype(jnp.bfloat16), w_ref[...],
                       preferred_element_type=jnp.float32,
                       precision=jax.lax.Precision.DEFAULT)

    xn = _ln_normalize(seq_ref[...].astype(jnp.float32), eps)    # (R, d_msa)
    sn = _ln_normalize(state_ref[...].astype(jnp.float32), eps)  # (R, d_state)

    # LayerNorm gamma/beta already folded into ws0/wsi/b0 by the wrapper.
    si = mm(xn, ws0_ref) + mm(sn, wsi_ref) + b0_ref[...]          # (R, H) f32

    # --- residual block 1 (in-place F.relu_ semantics: residual base = relu(si))
    si = jnp.maximum(si, 0.0)
    h = jnp.maximum(mm(si, w1_ref) + b1_ref[...], 0.0)
    si = si + mm(h, w2_ref) + b2_ref[...]

    # --- residual block 2
    si = jnp.maximum(si, 0.0)
    h = jnp.maximum(mm(si, w3_ref) + b3_ref[...], 0.0)
    si = si + mm(h, w4_ref) + b4_ref[...]

    # --- output head (leave the 20-lane output un-padded; output bytes ~7%)
    si = jnp.maximum(si, 0.0)
    out = mm(si, wout_ref) + bout_ref[...]                        # (R, 20)
    out_ref[...] = out.astype(out_ref.dtype)


# -----------------------------------------------------------------------------
# Wrapper
# -----------------------------------------------------------------------------
@functools.partial(jax.jit, static_argnames=("row_tile", "eps"))
def scpred_pallas(seq, state, params, *, row_tile=1024, eps=1e-5):
    B, L, d_msa = seq.shape
    d_state = state.shape[-1]
    d_hidden = params["w_s0"].shape[1]
    d_out = params["w_out"].shape[1]

    f32, bf16 = jnp.float32, jnp.bfloat16

    # ---- fold LayerNorm affine into the first projections (wrapper-side, tiny)
    #   LN(x)@W + b == xhat@(gamma*W) + (beta@W + b),  xhat = normalized x
    ws0 = (params["ln0_gamma"].astype(f32)[:, None] * params["w_s0"].astype(f32)).astype(bf16)
    wsi = (params["lni_gamma"].astype(f32)[:, None] * params["w_si"].astype(f32)).astype(bf16)
    b0 = (params["ln0_beta"].astype(f32) @ params["w_s0"].astype(f32)
          + params["b_s0"].astype(f32)
          + params["lni_beta"].astype(f32) @ params["w_si"].astype(f32)
          + params["b_si"].astype(f32)).reshape(1, d_hidden)

    w1 = params["w1"].astype(bf16); b1 = params["b1"].astype(f32).reshape(1, d_hidden)
    w2 = params["w2"].astype(bf16); b2 = params["b2"].astype(f32).reshape(1, d_hidden)
    w3 = params["w3"].astype(bf16); b3 = params["b3"].astype(f32).reshape(1, d_hidden)
    w4 = params["w4"].astype(bf16); b4 = params["b4"].astype(f32).reshape(1, d_hidden)
    wout = params["w_out"].astype(bf16); bout = params["b_out"].astype(f32).reshape(1, d_out)

    # ---- flatten token axis; NO wrapper pad (ragged last tile handled by Pallas)
    rows = B * L
    seq2 = seq.reshape(rows, d_msa)      # inputs kept in their HBM dtype (no cast)
    st2 = state.reshape(rows, d_state)

    # Row tile: big (amortize ~0.35us/step), multiple of 8, but keep >= 2 grid
    # steps so both v7x TensorCores get work under "parallel" semantics.
    R = max(8, min(row_tile, _round_up(pl.cdiv(rows, 2), 8)))
    grid = (pl.cdiv(rows, R),)

    const = lambda r: (0, 0)   # grid-invariant blocks (weights stay VMEM-resident)

    out = pl.pallas_call(
        functools.partial(_scpred_kernel, eps=eps),
        out_shape=jax.ShapeDtypeStruct((rows, d_out), jnp.float32),
        grid=grid,
        in_specs=[
            pl.BlockSpec((R, d_msa), lambda r: (r, 0)),
            pl.BlockSpec((R, d_state), lambda r: (r, 0)),
            pl.BlockSpec((d_msa, d_hidden), const),
            pl.BlockSpec((d_state, d_hidden), const),
            pl.BlockSpec((1, d_hidden), const),
            pl.BlockSpec((d_hidden, d_hidden), const),
            pl.BlockSpec((1, d_hidden), const),
            pl.BlockSpec((d_hidden, d_hidden), const),
            pl.BlockSpec((1, d_hidden), const),
            pl.BlockSpec((d_hidden, d_hidden), const),
            pl.BlockSpec((1, d_hidden), const),
            pl.BlockSpec((d_hidden, d_hidden), const),
            pl.BlockSpec((1, d_hidden), const),
            pl.BlockSpec((d_hidden, d_out), const),
            pl.BlockSpec((1, d_out), const),
        ],
        out_specs=pl.BlockSpec((R, d_out), lambda r: (r, 0)),
        compiler_params=pltpu.CompilerParams(
            dimension_semantics=("parallel",),
            # v5e scoped-VMEM default is only 16 MiB; raise explicitly so large
            # row tiles never hit a spurious limit (actual usage is a few MiB).
            vmem_limit_bytes=48 * 1024 * 1024,
        ),
    )(seq2, st2, ws0, wsi, b0, w1, b1, w2, b2, w3, b3, w4, b4, wout, bout)

    return out.reshape(B, L, 10, 2)


# -----------------------------------------------------------------------------
# Pure-JAX references
# -----------------------------------------------------------------------------
def scpred_reference(seq, state, params, eps=1e-5):
    """Full-f32 reference mirroring the PyTorch forward (incl. in-place F.relu_)."""
    def ln(x, g, b):
        mu = jnp.mean(x, axis=-1, keepdims=True)
        var = jnp.mean((x - mu) ** 2, axis=-1, keepdims=True)
        return (x - mu) / jnp.sqrt(var + eps) * g + b

    B, L, _ = seq.shape
    s0 = ln(seq, params["ln0_gamma"], params["ln0_beta"])
    s1 = ln(state, params["lni_gamma"], params["lni_beta"])
    si = s0 @ params["w_s0"] + params["b_s0"] + s1 @ params["w_si"] + params["b_si"]
    si = jax.nn.relu(si)
    si = si + jax.nn.relu(si @ params["w1"] + params["b1"]) @ params["w2"] + params["b2"]
    si = jax.nn.relu(si)
    si = si + jax.nn.relu(si @ params["w3"] + params["b3"]) @ params["w4"] + params["b4"]
    si = jax.nn.relu(si)
    si = si @ params["w_out"] + params["b_out"]
    return si.reshape(B, L, 10, 2)


def scpred_matched_reference(seq, state, params, eps=1e-5):
    """Reference that mirrors the kernel's numerics exactly (folded LN affine,
    single-pass LN stats, bf16 matmul inputs with fp32 accumulation)."""
    bf16 = jnp.bfloat16

    def mm(a, w):
        return jnp.dot(a.astype(bf16), w.astype(bf16),
                       preferred_element_type=jnp.float32,
                       precision=jax.lax.Precision.DEFAULT)

    B, L, _ = seq.shape
    ws0 = params["ln0_gamma"][:, None] * params["w_s0"]
    wsi = params["lni_gamma"][:, None] * params["w_si"]
    b0 = (params["ln0_beta"] @ params["w_s0"] + params["b_s0"]
          + params["lni_beta"] @ params["w_si"] + params["b_si"])

    xn = _ln_normalize(seq.astype(jnp.float32), eps)
    sn = _ln_normalize(state.astype(jnp.float32), eps)
    si = mm(xn, ws0) + mm(sn, wsi) + b0
    si = jax.nn.relu(si)
    si = si + mm(jax.nn.relu(mm(si, params["w1"]) + params["b1"]), params["w2"]) + params["b2"]
    si = jax.nn.relu(si)
    si = si + mm(jax.nn.relu(mm(si, params["w3"]) + params["b3"]), params["w4"]) + params["b4"]
    si = jax.nn.relu(si)
    si = mm(si, params["w_out"]) + params["b_out"]
    return si.reshape(B, L, 10, 2)


if __name__ == "__main__":
    # Keep the pure-JAX f32 reference at full matmul precision.
    jax.config.update("jax_default_matmul_precision", "highest")

    # Shapes consistent with the module (SCPred defaults: d_msa=256, d_state=32,
    # d_hidden=128, 20 outputs -> (10, 2)).
    B, L = 2, 16
    d_msa, d_state, d_hidden, d_out = 256, 32, 128, 20

    key = jax.random.PRNGKey(0)
    ks = jax.random.split(key, 16)

    seq = jax.random.normal(ks[0], (B, L, d_msa), dtype=jnp.float32)
    state = jax.random.normal(ks[1], (B, L, d_state), dtype=jnp.float32)

    def lin(k, fan_in, fan_out, scale):
        return jax.random.normal(k, (fan_in, fan_out), jnp.float32) * scale

    # Deterministic parameter init.  The module's reset_parameter zeroes
    # linear_2 / linear_4 weights & biases; we use small nonzero synthetic
    # values so the residual and output paths are actually exercised.
    params = {
        "ln0_gamma": 1.0 + 0.1 * jax.random.normal(ks[2], (d_msa,), jnp.float32),
        "ln0_beta": 0.1 * jax.random.normal(ks[3], (d_msa,), jnp.float32),
        "lni_gamma": 1.0 + 0.1 * jax.random.normal(ks[4], (d_state,), jnp.float32),
        "lni_beta": 0.1 * jax.random.normal(ks[5], (d_state,), jnp.float32),
        "w_s0": lin(ks[6], d_msa, d_hidden, (1.0 / d_msa) ** 0.5),
        "b_s0": jnp.zeros((d_hidden,), jnp.float32),
        "w_si": lin(ks[7], d_state, d_hidden, (1.0 / d_state) ** 0.5),
        "b_si": jnp.zeros((d_hidden,), jnp.float32),
        "w1": lin(ks[8], d_hidden, d_hidden, (2.0 / d_hidden) ** 0.5),
        "b1": jnp.zeros((d_hidden,), jnp.float32),
        "w2": lin(ks[9], d_hidden, d_hidden, 0.1 * (1.0 / d_hidden) ** 0.5),
        "b2": 0.01 * jnp.ones((d_hidden,), jnp.float32),
        "w3": lin(ks[10], d_hidden, d_hidden, (2.0 / d_hidden) ** 0.5),
        "b3": jnp.zeros((d_hidden,), jnp.float32),
        "w4": lin(ks[11], d_hidden, d_hidden, 0.1 * (1.0 / d_hidden) ** 0.5),
        "b4": 0.01 * jnp.ones((d_hidden,), jnp.float32),
        "w_out": lin(ks[12], d_hidden, d_out, (1.0 / d_hidden) ** 0.5),
        "b_out": 0.1 * jax.random.normal(ks[13], (d_out,), jnp.float32),
    }

    out = scpred_pallas(seq, state, params)
    out = jax.block_until_ready(out)

    ref_f32 = scpred_reference(seq, state, params)
    ref_bf16 = scpred_matched_reference(seq, state, params)
    assert out.shape == ref_f32.shape == (B, L, 10, 2)

    # (1) wiring correctness: kernel vs a JAX reference with identical numerics
    err_exact = float(jnp.max(jnp.abs(out - ref_bf16)))
    assert err_exact < 5e-3, f"kernel vs bf16-matched ref: max abs err = {err_exact}"

    # (2) semantic fidelity: bf16-matmul kernel vs full-f32 module reference
    err_model = float(jnp.max(jnp.abs(out - ref_f32)))
    assert err_model < 1e-1, f"kernel vs f32 module ref: max abs err = {err_model}"

    print("KERNEL_OK")
</pallas_src>

<mosaic_0001>
module attributes {stable_mosaic.version = 11 : i64} {
  func.func @_scpred_kernel(%arg0: i32, %arg1: memref<16x256xf32, #tpu.memory_space<vmem>>, %arg2: memref<16x32xf32, #tpu.memory_space<vmem>>, %arg3: memref<256x128xbf16, #tpu.memory_space<vmem>>, %arg4: memref<32x128xbf16, #tpu.memory_space<vmem>>, %arg5: memref<1x128xf32, #tpu.memory_space<vmem>>, %arg6: memref<128x128xbf16, #tpu.memory_space<vmem>>, %arg7: memref<1x128xf32, #tpu.memory_space<vmem>>, %arg8: memref<128x128xbf16, #tpu.memory_space<vmem>>, %arg9: memref<1x128xf32, #tpu.memory_space<vmem>>, %arg10: memref<128x128xbf16, #tpu.memory_space<vmem>>, %arg11: memref<1x128xf32, #tpu.memory_space<vmem>>, %arg12: memref<128x128xbf16, #tpu.memory_space<vmem>>, %arg13: memref<1x128xf32, #tpu.memory_space<vmem>>, %arg14: memref<128x20xbf16, #tpu.memory_space<vmem>>, %arg15: memref<1x20xf32, #tpu.memory_space<vmem>>, %arg16: memref<16x20xf32, #tpu.memory_space<vmem>>) attributes {dimension_semantics = [#tpu.dimension_semantics<parallel>], iteration_bounds = array<i64: 2>, scalar_prefetch = 0 : i64, scratch_operands = 0 : i64, tpu.core_type = #tpu.core_type<tc>, window_params = [{transform_indices = @transform_0, window_bounds = array<i64: 16, 256>}, {transform_indices = @transform_1, window_bounds = array<i64: 16, 32>}, {pipeline_mode = #tpu.pipeline_mode<synchronous>, transform_indices = @transform_2, window_bounds = array<i64: 256, 128>}, {pipeline_mode = #tpu.pipeline_mode<synchronous>, transform_indices = @transform_3, window_bounds = array<i64: 32, 128>}, {pipeline_mode = #tpu.pipeline_mode<synchronous>, transform_indices = @transform_4, window_bounds = array<i64: 1, 128>}, {pipeline_mode = #tpu.pipeline_mode<synchronous>, transform_indices = @transform_5, window_bounds = array<i64: 128, 128>}, {pipeline_mode = #tpu.pipeline_mode<synchronous>, transform_indices = @transform_6, window_bounds = array<i64: 1, 128>}, {pipeline_mode = #tpu.pipeline_mode<synchronous>, transform_indices = @transform_7, window_bounds = array<i64: 128, 128>}, {pipeline_mode = #tpu.pipeline_mode<synchronous>, transform_indices = @transform_8, window_bounds = array<i64: 1, 128>}, {pipeline_mode = #tpu.pipeline_mode<synchronous>, transform_indices = @transform_9, window_bounds = array<i64: 128, 128>}, {pipeline_mode = #tpu.pipeline_mode<synchronous>, transform_indices = @transform_10, window_bounds = array<i64: 1, 128>}, {pipeline_mode = #tpu.pipeline_mode<synchronous>, transform_indices = @transform_11, window_bounds = array<i64: 128, 128>}, {pipeline_mode = #tpu.pipeline_mode<synchronous>, transform_indices = @transform_12, window_bounds = array<i64: 1, 128>}, {pipeline_mode = #tpu.pipeline_mode<synchronous>, transform_indices = @transform_13, window_bounds = array<i64: 128, 20>}, {pipeline_mode = #tpu.pipeline_mode<synchronous>, transform_indices = @transform_14, window_bounds = array<i64: 1, 20>}, {transform_indices = @transform_15, window_bounds = array<i64: 16, 20>}]} {
    %c0 = arith.constant 0 : index
    %c0_0 = arith.constant 0 : index
    %0 = vector.load %arg1[%c0, %c0_0] : memref<16x256xf32, #tpu.memory_space<vmem>>, vector<16x256xf32>
    %cst = arith.constant dense<0.000000e+00> : vector<16xf32>
    %1 = vector.multi_reduction <add>, %0, %cst [1] : vector<16x256xf32> to vector<16xf32>
    %2 = vector.shape_cast %1 : vector<16xf32> to vector<16x1xf32>
    %cst_1 = arith.constant 3.906250e-03 : f32
    %3 = vector.broadcast %cst_1 : f32 to vector<16x1xf32>
    %4 = arith.mulf %2, %3 : vector<16x1xf32>
    %5 = arith.mulf %0, %0 : vector<16x256xf32>
    %cst_2 = arith.constant dense<0.000000e+00> : vector<16xf32>
    %6 = vector.multi_reduction <add>, %5, %cst_2 [1] : vector<16x256xf32> to vector<16xf32>
    %7 = vector.shape_cast %6 : vector<16xf32> to vector<16x1xf32>
    %cst_3 = arith.constant 3.906250e-03 : f32
    %8 = vector.broadcast %cst_3 : f32 to vector<16x1xf32>
    %9 = arith.mulf %7, %8 : vector<16x1xf32>
    %10 = arith.mulf %4, %4 : vector<16x1xf32>
    %11 = arith.subf %9, %10 : vector<16x1xf32>
    %cst_4 = arith.constant 0.000000e+00 : f32
    %12 = vector.broadcast %cst_4 : f32 to vector<16x1xf32>
    %13 = arith.maximumf %11, %12 : vector<16x1xf32>
    %14 = vector.broadcast %4 : vector<16x1xf32> to vector<16x256xf32>
    %15 = arith.subf %0, %14 : vector<16x256xf32>
    %cst_5 = arith.constant 9.99999974E-6 : f32
    %16 = vector.broadcast %cst_5 : f32 to vector<16x1xf32>
    %17 = arith.addf %13, %16 : vector<16x1xf32>
    %18 = math.rsqrt %17 : vector<16x1xf32>
    %19 = vector.broadcast %18 : vector<16x1xf32> to vector<16x256xf32>
    %20 = arith.mulf %15, %19 : vector<16x256xf32>
    %c0_6 = arith.constant 0 : index
    %c0_7 = arith.constant 0 : index
    %21 = vector.load %arg2[%c0_6, %c0_7] : memref<16x32xf32, #tpu.memory_space<vmem>>, vector<16x32xf32>
    %cst_8 = arith.constant dense<0.000000e+00> : vector<16xf32>
    %22 = vector.multi_reduction <add>, %21, %cst_8 [1] : vector<16x32xf32> to vector<16xf32>
    %23 = vector.shape_cast %22 : vector<16xf32> to vector<16x1xf32>
    %cst_9 = arith.constant 3.125000e-02 : f32
    %24 = vector.broadcast %cst_9 : f32 to vector<16x1xf32>
    %25 = arith.mulf %23, %24 : vector<16x1xf32>
    %26 = arith.mulf %21, %21 : vector<16x32xf32>
    %cst_10 = arith.constant dense<0.000000e+00> : vector<16xf32>
    %27 = vector.multi_reduction <add>, %26, %cst_10 [1] : vector<16x32xf32> to vector<16xf32>
    %28 = vector.shape_cast %27 : vector<16xf32> to vector<16x1xf32>
    %cst_11 = arith.constant 3.125000e-02 : f32
    %29 = vector.broadcast %cst_11 : f32 to vector<16x1xf32>
    %30 = arith.mulf %28, %29 : vector<16x1xf32>
    %31 = arith.mulf %25, %25 : vector<16x1xf32>
    %32 = arith.subf %30, %31 : vector<16x1xf32>
    %cst_12 = arith.constant 0.000000e+00 : f32
    %33 = vector.broadcast %cst_12 : f32 to vector<16x1xf32>
    %34 = arith.maximumf %32, %33 : vector<16x1xf32>
    %35 = vector.broadcast %25 : vector<16x1xf32> to vector<16x32xf32>
    %36 = arith.subf %21, %35 : vector<16x32xf32>
    %cst_13 = arith.constant 9.99999974E-6 : f32
    %37 = vector.broadcast %cst_13 : f32 to vector<16x1xf32>
    %38 = arith.addf %34, %37 : vector<16x1xf32>
    %39 = math.rsqrt %38 : vector<16x1xf32>
    %40 = vector.broadcast %39 : vector<16x1xf32> to vector<16x32xf32>
    %41 = arith.mulf %36, %40 : vector<16x32xf32>
    %42 = arith.truncf %20 : vector<16x256xf32> to vector<16x256xbf16>
    %c0_14 = arith.constant 0 : index
    %c0_15 = arith.constant 0 : index
    %43 = vector.load %arg3[%c0_14, %c0_15] : memref<256x128xbf16, #tpu.memory_space<vmem>>, vector<256x128xbf16>
    %cst_16 = arith.constant dense<0.000000e+00> : vector<16x128xf32>
    %44 = tpu.matmul %42, %43, %cst_16 {dimension_numbers = #tpu.dot_dimension_numbers<[1], [0], [0], [1], [0, 0, 1, 1], [], []>} : vector<16x256xbf16>, vector<256x128xbf16>, vector<16x128xf32> -> vector<16x128xf32>
    %45 = arith.truncf %41 : vector<16x32xf32> to vector<16x32xbf16>
    %c0_17 = arith.constant 0 : index
    %c0_18 = arith.constant 0 : index
    %46 = vector.load %arg4[%c0_17, %c0_18] : memref<32x128xbf16, #tpu.memory_space<vmem>>, vector<32x128xbf16>
    %cst_19 = arith.constant dense<0.000000e+00> : vector<16x128xf32>
    %47 = tpu.matmul %45, %46, %cst_19 {dimension_numbers = #tpu.dot_dimension_numbers<[1], [0], [0], [1], [0, 0, 1, 1], [], []>} : vector<16x32xbf16>, vector<32x128xbf16>, vector<16x128xf32> -> vector<16x128xf32>
    %48 = arith.addf %44, %47 : vector<16x128xf32>
    %c0_20 = arith.constant 0 : index
    %c0_21 = arith.constant 0 : index
    %49 = vector.load %arg5[%c0_20, %c0_21] : memref<1x128xf32, #tpu.memory_space<vmem>>, vector<1x128xf32>
    %50 = vector.broadcast %49 : vector<1x128xf32> to vector<16x128xf32>
    %51 = arith.addf %48, %50 : vector<16x128xf32>
    %cst_22 = arith.constant 0.000000e+00 : f32
    %52 = vector.broadcast %cst_22 : f32 to vector<16x128xf32>
    %53 = arith.maximumf %51, %52 : vector<16x128xf32>
    %54 = arith.truncf %53 : vector<16x128xf32> to vector<16x128xbf16>
    %c0_23 = arith.constant 0 : index
    %c0_24 = arith.constant 0 : index
    %55 = vector.load %arg6[%c0_23, %c0_24] : memref<128x128xbf16, #tpu.memory_space<vmem>>, vector<128x128xbf16>
    %cst_25 = arith.constant dense<0.000000e+00> : vector<16x128xf32>
    %56 = tpu.matmul %54, %55, %cst_25 {dimension_numbers = #tpu.dot_dimension_numbers<[1], [0], [0], [1], [0, 0, 1, 1], [], []>} : vector<16x128xbf16>, vector<128x128xbf16>, vector<16x128xf32> -> vector<16x128xf32>
    %c0_26 = arith.constant 0 : index
    %c0_27 = arith.constant 0 : index
    %57 = vector.load %arg7[%c0_26, %c0_27] : memref<1x128xf32, #tpu.memory_space<vmem>>, vector<1x128xf32>
    %58 = vector.broadcast %57 : vector<1x128xf32> to vector<16x128xf32>
    %59 = arith.addf %56, %58 : vector<16x128xf32>
    %cst_28 = arith.constant 0.000000e+00 : f32
    %60 = vector.broadcast %cst_28 : f32 to vector<16x128xf32>
    %61 = arith.maximumf %59, %60 : vector<16x128xf32>
    %62 = arith.truncf %61 : vector<16x128xf32> to vector<16x128xbf16>
    %c0_29 = arith.constant 0 : index
    %c0_30 = arith.constant 0 : index
    %63 = vector.load %arg8[%c0_29, %c0_30] : memref<128x128xbf16, #tpu.memory_space<vmem>>, vector<128x128xbf16>
    %cst_31 = arith.constant dense<0.000000e+00> : vector<16x128xf32>
    %64 = tpu.matmul %62, %63, %cst_31 {dimension_numbers = #tpu.dot_dimension_numbers<[1], [0], [0], [1], [0, 0, 1, 1], [], []>} : vector<16x128xbf16>, vector<128x128xbf16>, vector<16x128xf32> -> vector<16x128xf32>
    %65 = arith.addf %53, %64 : vector<16x128xf32>
    %c0_32 = arith.constant 0 : index
    %c0_33 = arith.constant 0 : index
    %66 = vector.load %arg9[%c0_32, %c0_33] : memref<1x128xf32, #tpu.memory_space<vmem>>, vector<1x128xf32>
    %67 = vector.broadcast %66 : vector<1x128xf32> to vector<16x128xf32>
    %68 = arith.addf %65, %67 : vector<16x128xf32>
    %cst_34 = arith.constant 0.000000e+00 : f32
    %69 = vector.broadcast %cst_34 : f32 to vector<16x128xf32>
    %70 = arith.maximumf %68, %69 : vector<16x128xf32>
    %71 = arith.truncf %70 : vector<16x128xf32> to vector<16x128xbf16>
    %c0_35 = arith.constant 0 : index
    %c0_36 = arith.constant 0 : index
    %72 = vector.load %arg10[%c0_35, %c0_36] : memref<128x128xbf16, #tpu.memory_space<vmem>>, vector<128x128xbf16>
    %cst_37 = arith.constant dense<0.000000e+00> : vector<16x128xf32>
    %73 = tpu.matmul %71, %72, %cst_37 {dimension_numbers = #tpu.dot_dimension_numbers<[1], [0], [0], [1], [0, 0, 1, 1], [], []>} : vector<16x128xbf16>, vector<128x128xbf16>, vector<16x128xf32> -> vector<16x128xf32>
    %c0_38 = arith.constant 0 : index
    %c0_39 = arith.constant 0 : index
    %74 = vector.load %arg11[%c0_38, %c0_39] : memref<1x128xf32, #tpu.memory_space<vmem>>, vector<1x128xf32>
    %75 = vector.broadcast %74 : vector<1x128xf32> to vector<16x128xf32>
    %76 = arith.addf %73, %75 : vector<16x128xf32>
    %cst_40 = arith.constant 0.000000e+00 : f32
    %77 = vector.broadcast %cst_40 : f32 to vector<16x128xf32>
    %78 = arith.maximumf %76, %77 : vector<16x128xf32>
    %79 = arith.truncf %78 : vector<16x128xf32> to vector<16x128xbf16>
    %c0_41 = arith.constant 0 : index
    %c0_42 = arith.constant 0 : index
    %80 = vector.load %arg12[%c0_41, %c0_42] : memref<128x128xbf16, #tpu.memory_space<vmem>>, vector<128x128xbf16>
    %cst_43 = arith.constant dense<0.000000e+00> : vector<16x128xf32>
    %81 = tpu.matmul %79, %80, %cst_43 {dimension_numbers = #tpu.dot_dimension_numbers<[1], [0], [0], [1], [0, 0, 1, 1], [], []>} : vector<16x128xbf16>, vector<128x128xbf16>, vector<16x128xf32> -> vector<16x128xf32>
    %82 = arith.addf %70, %81 : vector<16x128xf32>
    %c0_44 = arith.constant 0 : index
    %c0_45 = arith.constant 0 : index
    %83 = vector.load %arg13[%c0_44, %c0_45] : memref<1x128xf32, #tpu.memory_space<vmem>>, vector<1x128xf32>
    %84 = vector.broadcast %83 : vector<1x128xf32> to vector<16x128xf32>
    %85 = arith.addf %82, %84 : vector<16x128xf32>
    %cst_46 = arith.constant 0.000000e+00 : f32
    %86 = vector.broadcast %cst_46 : f32 to vector<16x128xf32>
    %87 = arith.maximumf %85, %86 : vector<16x128xf32>
    %88 = arith.truncf %87 : vector<16x128xf32> to vector<16x128xbf16>
    %c0_47 = arith.constant 0 : index
    %c0_48 = arith.constant 0 : index
    %89 = vector.load %arg14[%c0_47, %c0_48] : memref<128x20xbf16, #tpu.memory_space<vmem>>, vector<128x20xbf16>
    %cst_49 = arith.constant dense<0.000000e+00> : vector<16x20xf32>
    %90 = tpu.matmul %88, %89, %cst_49 {dimension_numbers = #tpu.dot_dimension_numbers<[1], [0], [0], [1], [0, 0, 1, 1], [], []>} : vector<16x128xbf16>, vector<128x20xbf16>, vector<16x20xf32> -> vector<16x20xf32>
    %c0_50 = arith.constant 0 : index
    %c0_51 = arith.constant 0 : index
    %91 = vector.load %arg15[%c0_50, %c0_51] : memref<1x20xf32, #tpu.memory_space<vmem>>, vector<1x20xf32>
    %92 = vector.broadcast %91 : vector<1x20xf32> to vector<16x20xf32>
    %93 = arith.addf %90, %92 : vector<16x20xf32>
    %c0_52 = arith.constant 0 : index
    %c0_53 = arith.constant 0 : index
    %94 = vector.load %arg16[%c0_52, %c0_53] : memref<16x20xf32, #tpu.memory_space<vmem>>, vector<16x20xf32>
    tpu.vector_store %arg16[%c0_52, %c0_53], %93 {strides = array<i32>} : memref<16x20xf32, #tpu.memory_space<vmem>>, vector<16x20xf32>,
    return
  }
  func.func @transform_0(%arg0: i32) -> (i32, i32) {
    %c0_i32 = arith.constant 0 : i32
    %c0_i32_0 = arith.constant 0 : i32
    return %arg0, %c0_i32 : i32, i32
  }
  func.func @transform_1(%arg0: i32) -> (i32, i32) {
    %c0_i32 = arith.constant 0 : i32
    %c0_i32_0 = arith.constant 0 : i32
    return %arg0, %c0_i32 : i32, i32
  }
  func.func @transform_2(%arg0: i32) -> (i32, i32) {
    %c0_i32 = arith.constant 0 : i32
    %c0_i32_0 = arith.constant 0 : i32
    %c0_i32_1 = arith.constant 0 : i32
    return %c0_i32, %c0_i32_0 : i32, i32
  }
  func.func @transform_3(%arg0: i32) -> (i32, i32) {
    %c0_i32 = arith.constant 0 : i32
    %c0_i32_0 = arith.constant 0 : i32
    %c0_i32_1 = arith.constant 0 : i32
    return %c0_i32, %c0_i32_0 : i32, i32
  }
  func.func @transform_4(%arg0: i32) -> (i32, i32) {
    %c0_i32 = arith.constant 0 : i32
    %c0_i32_0 = arith.constant 0 : i32
    %c0_i32_1 = arith.constant 0 : i32
    return %c0_i32, %c0_i32_0 : i32, i32
  }
  func.func @transform_5(%arg0: i32) -> (i32, i32) {
    %c0_i32 = arith.constant 0 : i32
    %c0_i32_0 = arith.constant 0 : i32
    %c0_i32_1 = arith.constant 0 : i32
    return %c0_i32, %c0_i32_0 : i32, i32
  }
  func.func @transform_6(%arg0: i32) -> (i32, i32) {
    %c0_i32 = arith.constant 0 : i32
    %c0_i32_0 = arith.constant 0 : i32
    %c0_i32_1 = arith.constant 0 : i32
    return %c0_i32, %c0_i32_0 : i32, i32
  }
  func.func @transform_7(%arg0: i32) -> (i32, i32) {
    %c0_i32 = arith.constant 0 : i32
    %c0_i32_0 = arith.constant 0 : i32
    %c0_i32_1 = arith.constant 0 : i32
    return %c0_i32, %c0_i32_0 : i32, i32
  }
  func.func @transform_8(%arg0: i32) -> (i32, i32) {
    %c0_i32 = arith.constant 0 : i32
    %c0_i32_0 = arith.constant 0 : i32
    %c0_i32_1 = arith.constant 0 : i32
    return %c0_i32, %c0_i32_0 : i32, i32
  }
  func.func @transform_9(%arg0: i32) -> (i32, i32) {
    %c0_i32 = arith.constant 0 : i32
    %c0_i32_0 = arith.constant 0 : i32
    %c0_i32_1 = arith.constant 0 : i32
    return %c0_i32, %c0_i32_0 : i32, i32
  }
  func.func @transform_10(%arg0: i32) -> (i32, i32) {
    %c0_i32 = arith.constant 0 : i32
    %c0_i32_0 = arith.constant 0 : i32
    %c0_i32_1 = arith.constant 0 : i32
    return %c0_i32, %c0_i32_0 : i32, i32
  }
  func.func @transform_11(%arg0: i32) -> (i32, i32) {
    %c0_i32 = arith.constant 0 : i32
    %c0_i32_0 = arith.constant 0 : i32
    %c0_i32_1 = arith.constant 0 : i32
    return %c0_i32, %c0_i32_0 : i32, i32
  }
  func.func @transform_12(%arg0: i32) -> (i32, i32) {
    %c0_i32 = arith.constant 0 : i32
    %c0_i32_0 = arith.constant 0 : i32
    %c0_i32_1 = arith.constant 0 : i32
    return %c0_i32, %c0_i32_0 : i32, i32
  }
  func.func @transform_13(%arg0: i32) -> (i32, i32) {
    %c0_i32 = arith.constant 0 : i32
    %c0_i32_0 = arith.constant 0 : i32
    %c0_i32_1 = arith.constant 0 : i32
    return %c0_i32, %c0_i32_0 : i32, i32
  }
  func.func @transform_14(%arg0: i32) -> (i32, i32) {
    %c0_i32 = arith.constant 0 : i32
    %c0_i32_0 = arith.constant 0 : i32
    %c0_i32_1 = arith.constant 0 : i32
    return %c0_i32, %c0_i32_0 : i32, i32
  }
  func.func @transform_15(%arg0: i32) -> (i32, i32) {
    %c0_i32 = arith.constant 0 : i32
    %c0_i32_0 = arith.constant 0 : i32
    return %arg0, %c0_i32 : i32, i32
  }
}

</mosaic_0001>

<bundles_post_ra>
// kernel: scpred_pallas.1
= control target key start
LH: loop header
LB: loop body
LE: loop exit
PB: predicated region body
PF: predicated region fallthrough
CT: control target
= control target key end

     0   :  { %s1755_s18 = smov 0   ;;  %s2038_s0 = inlined_call_operand.vmem [shape: f32[32,256], index: 0, kind: input, shape index: {}]   ;;  %s2039_s1 = inlined_call_operand.vmem [shape: f32[32,32], index: 1, kind: input, shape index: {}]   ;;  %s2040_s2 = inlined_call_operand.vmem [shape: bf16[256,128], index: 2, kind: input, shape index: {}]   ;;  %s2041_s3 = inlined_call_operand.vmem [shape: bf16[32,128], index: 3, kind: input, shape index: {}]   ;;  %s2042_s4 = inlined_call_operand.vmem [shape: f32[1,128], index: 4, kind: input, shape index: {}]   ;;  %s2043_s5 = inlined_call_operand.vmem [shape: bf16[128,128], index: 5, kind: input, shape index: {}]   ;;  %s2044_s6 = inlined_call_operand.vmem [shape: f32[1,128], index: 6, kind: input, shape index: {}]   ;;  %s2045_s7 = inlined_call_operand.vmem [shape: bf16[128,128], index: 7, kind: input, shape index: {}]   ;;  %s2046_s8 = inlined_call_operand.vmem [shape: f32[1,128], index: 8, kind: input, shape index: {}]   ;;  %s2047_s9 = inlined_call_operand.vmem [shape: bf16[128,128], index: 9, kind: input, shape index: {}]   ;;  %s2048_s10 = inlined_call_operand.vmem [shape: f32[1,128], index: 10, kind: input, shape index: {}]   ;;  %s2049_s11 = inlined_call_operand.vmem [shape: bf16[128,128], index: 11, kind: input, shape index: {}]   ;;  %s2050_s12 = inlined_call_operand.vmem [shape: f32[1,128], index: 12, kind: input, shape index: {}]   ;;  %s2051_s13 = inlined_call_operand.vmem [shape: bf16[128,20], index: 13, kind: input, shape index: {}]   ;;  %s2052_s14 = inlined_call_operand.vmem [shape: f32[1,20], index: 14, kind: input, shape index: {}]   ;;  %s2053_s15 = inlined_call_operand.vmem [shape: f32[32,20], index: 15, kind: output, shape index: {}]  }
   0x1 LB: > { %s1339_s19 = sadd.s32 4294967295, %s1673_s18   ;;  %p1343_p0 = scmp.ge.s32.totalorder %s1673_s18, 1  ;;  %s1673_s18 = sphi %s1755_s18, %s25_s18  }
   0x2   : > { %p450_p1 = scmp.lt.s32.totalorder %s1673_s18, 3 }
   0x4   : > { %p451_p2 = pnand %p1343_p0, %p450_p1 }
   0x5   : > { %s1344_s20 = sshll.u32 (!%p451_p2), %s1339_s19, 1 }
   0x6   : > { %454 = sbr.rel (%p451_p2) target bundleno = 1044 (0x414), region = 80  ;;  %p505_p3 = scmp.lt.s32.totalorder (!%p451_p2), %s1344_s20, 3 }
   0xb   : > { %s2055_s20 = smov (!%p505_p3, %s1344_s20), 3  ;;  %vm586_vm0 = vcmask 261120   ;;  %v1594_v20 = vld [vmem:[%s2040_s2 + $0x38] sm:$0xff]  ;;  %v1593_v22 = vld [vmem:[%s2040_s2 + $0x30] sm:$0xff]  ;;  %v1592_v24 = vld [vmem:[%s2040_s2 + $0x28] sm:$0xff]  ;;  %vm1268_vm13 = vcmask 162816  }
   0xc   : > { %s1586_s21 = sshll.u32 %s2055_s20, 4  ;;  %s1348_s22 = sshll.u32 %s2055_s20, 3  ;;  %v1602_v21 = vld [vmem:[%s2040_s2 + $0x78] sm:$0xff]  ;;  %801 = vmatpush.bf16.msra.mxu1 %v1594_v20  ;;  %v1601_v23 = vld [vmem:[%s2040_s2 + $0x70] sm:$0xff]  ;;  %v1600_v25 = vld [vmem:[%s2040_s2 + $0x68] sm:$0xff] }
   0xd   : > { %s509_s25 = scalar_lea.vmem %s2038_s0, %s1586_s21  ;;  %s515_s28 = scalar_lea.vmem %s2039_s1, %s1348_s22  ;;  %815 = vmatpush.bf16.msra.mxu2 %v1602_v21  ;;  %v1591_v26 = vld [vmem:[%s2040_s2 + $0x20] sm:$0xff]  ;;  %v1590_v28 = vld [vmem:[%s2040_s2 + $0x18] sm:$0xff]  ;;  %v1589_v30 = vld [vmem:[%s2040_s2 + $0x10] sm:$0xff] }
   0xe   : > { %v1775_v0 = vld [vmem:[%s509_s25] sm:$0xff]  ;;  %v1777_v1 = vld [vmem:[%s509_s25 + $0x8] sm:$0xff]  ;;  %v1789_v7 = vld [vmem:[%s509_s25 + $0x10] sm:$0xff]  ;;  %s521_s27 = scalar_lea.vmem %s2053_s15, %s1348_s22 }
   0xf   : > { %v1779_v2 = vld [vmem:[%s515_s28] sm:$0xff]  ;;  %v528_v3 = vadd.f32 %v1777_v1, %v1775_v0  ;;  %v536_v4 = vmul.f32 %v1775_v0, %v1775_v0  ;;  %v537_v5 = vmul.f32 %v1777_v1, %v1777_v1  ;;  %v1791_v8 = vld [vmem:[%s509_s25 + $0x18] sm:$0xff]  ;;  %v1793_v10 = vld [vmem:[%s515_s28 + $0x8] sm:$0xff]  ;;  %v538_v11 = vmul.f32 %v1789_v7, %v1789_v7 }
  0x10   : > { %v587_v6 = vsel %vm586_vm0, %v1779_v2, 0.0  ;;  %v539_v12 = vmul.f32 %v1791_v8, %v1791_v8  ;;  %v531_v13 = vadd.f32 %v1791_v8, %v1789_v7  ;;  %v590_v14 = vsel %vm586_vm0, %v1793_v10, 0.0  ;;  %802 = vmatpush.bf16.msra.mxu1 %v1593_v22  ;;  %v1599_v27 = vld [vmem:[%s2040_s2 + $0x60] sm:$0xff]  ;;  %v1598_v29 = vld [vmem:[%s2040_s2 + $0x58] sm:$0xff]  ;;  %v1597_v31 = vld [vmem:[%s2040_s2 + $0x50] sm:$0xff] }
  0x11   : > { %588 = vadd.xlane.f32.xlu2 %v587_v6  ;;  %529 = vadd.xlane.f32.xlu0 %v528_v3  ;;  %v540_v9 = vadd.f32 %v537_v5, %v536_v4  ;;  %v595_v16 = vmul.f32 %v1779_v2, %v1779_v2  ;;  %v596_v17 = vmul.f32 %v1793_v10, %v1793_v10  ;;  %v1588_v35 = vld [vmem:[%s2040_s2 + $0x8] sm:$0xff]  ;;  %v1587_v41 = vld [vmem:[%s2040_s2] sm:$0xff]  ;;  %v1612_v62 = vld [vmem:[%s2043_s5 + $0x38] sm:$0xff] }
  0x12   : > { %v543_v15 = vadd.f32 %v539_v12, %v538_v11  ;;  %816 = vmatpush.bf16.msra.mxu2 %v1601_v23  ;;  %v1596_v36 = vld [vmem:[%s2040_s2 + $0x48] sm:$0xff]  ;;  %v1595_v42 = vld [vmem:[%s2040_s2 + $0x40] sm:$0xff]  ;;  %906 = vmatpush.bf16.msra.mxu3 %v1612_v62 }
  0x13   : > { %541 = vadd.xlane.f32.xlu1 %v540_v9  ;;  %v597_v18 = vsel %vm586_vm0, %v595_v16, 0.0  ;;  %v600_v19 = vsel %vm586_vm0, %v596_v17, 0.0  ;;  %v1604_v47 = vld [vmem:[%s2041_s3 + $0x8] sm:$0xff]  ;;  %v1603_v51 = vld [vmem:[%s2041_s3] sm:$0xff] }
  0x14   : > { %803 = vmatpush.bf16.msra.mxu1 %v1592_v24  ;;  %697 = vmatpush.bf16.msra.mxu0 %v1604_v47 }
  0x16   : > { %817 = vmatpush.bf16.msra.mxu2 %v1600_v25 }
  0x18   : > { %804 = vmatpush.bf16.msra.mxu1 %v1591_v26  ;;  %698 = vmatpush.bf16.msra.mxu0 %v1603_v51 }
  0x19   : > { %591 = vadd.xlane.f32.xlu2 %v590_v14  ;;  %532 = vadd.xlane.f32.xlu0 %v531_v13 }
  0x1a   : > { %818 = vmatpush.bf16.msra.mxu2 %v1599_v27 }
  0x1b   : > { %544 = vadd.xlane.f32.xlu1 %v543_v15 }
  0x1c   : > { %805 = vmatpush.bf16.msra.mxu1 %v1590_v28 }
  0x1e   : > { %819 = vmatpush.bf16.msra.mxu2 %v1598_v29 }
  0x20   : > { %806 = vmatpush.bf16.msra.mxu1 %v1589_v30 }
  0x21   : > { %598 = vadd.xlane.f32.xlu0 %v597_v18 }
  0x22   : > { %820 = vmatpush.bf16.msra.mxu2 %v1597_v31 }
  0x23   : > { %601 = vadd.xlane.f32.xlu1 %v600_v19 }
  0x24   : > { %807 = vmatpush.bf16.msra.mxu1 %v1588_v35 }
  0x26   : > { %821 = vmatpush.bf16.msra.mxu2 %v1596_v36 }
  0x28   : > { %808 = vmatpush.bf16.msra.mxu1 %v1587_v41 }
  0x2a   : > { %822 = vmatpush.bf16.msra.mxu2 %v1595_v42 }
  0x84   : > { %v530_v32 = vpop.xlane.xlu0 %529  ;;  %v589_v33 = vpop.xlane.xlu2 %588 }
  0x85   : > { %v1845_v34 = vmul.f32 0.00390625, %v530_v32  ;;  %v1871_v53 = vmul.f32 0.03125, %v589_v33 }
  0x86   : > { %v542_v37 = vpop.xlane.xlu1 %541 }
  0x87   : > { %v546_v38 = vmul.f32 0.00390625, %v542_v37  ;;  %v548_v39 = vmul.f32 %v1845_v34, %v1845_v34  ;;  %v605_v59 = vmul.f32 %v1871_v53, %v1871_v53  ;;  %v554_v30 = vsub.f32 %v1775_v0, %v1845_v34 }
  0x88   : > { %v555_v31 = vsub.f32 %v1777_v1, %v1845_v34 }
  0x89   : > { %v550_v40 = vsub.f32 %v546_v38, %v548_v39 }
  0x8b   : > { %v552_v43 = vmax.f32 %v550_v40, 0.0 }
  0x8c   : > { %v533_v44 = vpop.xlane.xlu0 %532  ;;  %v592_v49 = vpop.xlane.xlu2 %591 }
  0x8d   : > { %v558_v45 = vadd.f32 1e-05, %v552_v43  ;;  %v1861_v46 = vmul.f32 0.00390625, %v533_v44  ;;  %v1873_v54 = vmul.f32 0.03125, %v592_v49 }
  0x8e   : > { %v545_v48 = vpop.xlane.xlu1 %544 }
  0x8f   : > { %1659 = vrsqrt.f32 %v558_v45  ;;  %v547_v50 = vmul.f32 0.00390625, %v545_v48  ;;  %v549_v52 = vmul.f32 %v1861_v46, %v1861_v46  ;;  %v606_v60 = vmul.f32 %v1873_v54, %v1873_v54 }
  0x90   : > { %vm566_vm2 = vweird.f32 %v558_v45  ;;  %v556_v33 = vsub.f32 %v1789_v7, %v1861_v46  ;;  %v557_v35 = vsub.f32 %v1791_v8, %v1861_v46  ;;  %v611_v46 = vsub.f32 %v1779_v2, %v1871_v53  ;;  %v1609_v2 = vld [vmem:[%s2043_s5 + $0x20] sm:$0xff]  ;;  %v1607_v53 = vld [vmem:[%s2043_s5 + $0x10] sm:$0xff] }
  0x91   : > { %v551_v55 = vsub.f32 %v547_v50, %v549_v52  ;;  %v612_v47 = vsub.f32 %v1793_v10, %v1873_v54  ;;  %v1611_v52 = vld [vmem:[%s2043_s5 + $0x30] sm:$0xff]  ;;  %v1608_v10 = vld [vmem:[%s2043_s5 + $0x18] sm:$0xff]  ;;  %v1606_v54 = vld [vmem:[%s2043_s5 + $0x8] sm:$0xff] }
  0x92   : > { %907 = vmatpush.bf16.msra.mxu3 %v1611_v52  ;;  %v1629_v52 = vld [vmem:[%s2049_s11] sm:$0xff] }
  0x93   : > { %v553_v56 = vmax.f32 %v551_v55, 0.0  ;;  %v1610_v55 = vld [vmem:[%s2043_s5 + $0x28] sm:$0xff] }
  0x94   : > { %v599_v57 = vpop.xlane.xlu0 %598 }
  0x95   : > { %v1660_v58 = vpop.eup %1659  ;;  %v603_v61 = vmul.f32 0.03125, %v599_v57  ;;  %v559_v3 = vadd.f32 1e-05, %v553_v56  ;;  %v1605_v56 = vld [vmem:[%s2043_s5] sm:$0xff]  ;;  %v1620_v57 = vld [vmem:[%s2045_s7 + $0x38] sm:$0xff] }
  0x96   : > { %v561_v63 = vmul.f32 %v1660_v58, %v558_v45  ;;  %v602_v4 = vpop.xlane.xlu1 %601  ;;  %vm567_vm1 = vweird.f32 %v1660_v58  ;;  %908 = vmatpush.bf16.msra.mxu3 %v1610_v55  ;;  %987 = vmatpush.bf16.msrb.mxu0 %v1620_v57  ;;  %v1644_v55 = vld [vmem:[%s2051_s13 + $0x38] sm:$0xff] }
  0x97   : > { %v607_v5 = vsub.f32 %v603_v61, %v605_v59  ;;  %v604_v6 = vmul.f32 0.03125, %v602_v4  ;;  %1661 = vrsqrt.f32 %v559_v3  ;;  %vm568_vm3 = vmor %vm566_vm2, %vm567_vm1  ;;  %vm576_vm5 = vweird.f32 %v559_v3  ;;  %v1618_v59 = vld [vmem:[%s2045_s7 + $0x28] sm:$0xff] }
  0x98   : > { %v562_v9 = vmul.f32 %v1660_v58, %v561_v63 }
  0x99   : > { %v609_v11 = vmax.f32 %v607_v5, 0.0  ;;  %v608_v12 = vsub.f32 %v604_v6, %v606_v60  ;;  %v1617_v60 = vld [vmem:[%s2045_s7 + $0x20] sm:$0xff] }
  0x9a   : > { %v563_v13 = vmul.f32 0.5, %v562_v9  ;;  %909 = vmatpush.bf16.msra.mxu3 %v1609_v2  ;;  %v1653_v5 = vld [vmem:[%s2042_s4] ss:$0 sm:$0xff]  ;;  %v1643_v2 = vld [vmem:[%s2051_s13 + $0x30] sm:$0xff] }
  0x9b   : > { %v613_v14 = vadd.f32 1e-05, %v609_v11  ;;  %v610_v15 = vmax.f32 %v608_v12, 0.0 }
  0x9c   : > { %v564_v18 = vsub.f32 1.5, %v563_v13 }
  0x9d   : > { %1663 = vrsqrt.f32 %v613_v14  ;;  %v614_v16 = vadd.f32 1e-05, %v610_v15  ;;  %v1662_v17 = vpop.eup %1661  ;;  %vm621_vm8 = vweird.f32 %v613_v14 }
  0x9e   : > { %v571_v19 = vmul.f32 %v1662_v17, %v559_v3  ;;  %v565_v21 = vmul.f32 %v1660_v58, %v564_v18  ;;  %vm577_vm4 = vweird.f32 %v1662_v17  ;;  %910 = vmatpush.bf16.msra.mxu3 %v1608_v10  ;;  %v1642_v10 = vld [vmem:[%s2051_s13 + $0x28] sm:$0xff] }
  0x9f   : > { %1665 = vrsqrt.f32 %v614_v16  ;;  %vm578_vm6 = vmor %vm576_vm5, %vm577_vm4  ;;  %vm631_vm11 = vweird.f32 %v614_v16 }
  0xa0   : > { %v572_v20 = vmul.f32 %v1662_v17, %v571_v19  ;;  %v569_v29 = vsel %vm568_vm3, %v1660_v58, %v565_v21  ;;  %v1619_v58 = vld [vmem:[%s2045_s7 + $0x30] sm:$0xff]  ;;  %v1616_v19 = vld [vmem:[%s2045_s7 + $0x18] sm:$0xff]  ;;  %v1614_v21 = vld [vmem:[%s2045_s7 + $0x8] sm:$0xff] }
  0xa1   : > { %v580_v39 = vmul.f32 %v569_v29, %v554_v30  ;;  %v581_v40 = vmul.f32 %v569_v29, %v555_v31  ;;  %988 = vmatpush.bf16.msrb.mxu0 %v1619_v58 }
  0xa2   : > { %v573_v23 = vmul.f32 0.5, %v572_v20  ;;  %911 = vmatpush.bf16.msra.mxu3 %v1607_v53  ;;  %v1615_v20 = vld [vmem:[%s2045_s7 + $0x10] sm:$0xff]  ;;  %v1641_v53 = vld [vmem:[%s2051_s13 + $0x20] sm:$0xff] }
  0xa3   : > { %v1664_v22 = vpop.eup %1663 }
  0xa4   : > { %v616_v24 = vmul.f32 %v1664_v22, %v613_v14  ;;  %v574_v26 = vsub.f32 1.5, %v573_v23  ;;  %vm622_vm7 = vweird.f32 %v1664_v22  ;;  %v1628_v23 = vld [vmem:[%s2047_s9 + $0x38] sm:$0xff] }
  0xa5   : > { %v1666_v25 = vpop.eup %1665  ;;  %vm623_vm10 = vmor %vm621_vm8, %vm622_vm7  ;;  %989 = vmatpush.bf16.msrb.mxu0 %v1618_v59  ;;  %1080 = vmatpush.bf16.msrb.mxu1 %v1628_v23 }
  0xa6   : > { %v617_v27 = vmul.f32 %v1664_v22, %v616_v24  ;;  %v626_v28 = vmul.f32 %v1666_v25, %v614_v16  ;;  %v575_v32 = vmul.f32 %v1662_v17, %v574_v26  ;;  %vm632_vm9 = vweird.f32 %v1666_v25  ;;  %912 = vmatpush.bf16.msra.mxu3 %v1606_v54  ;;  %v1627_v24 = vld [vmem:[%s2047_s9 + $0x30] sm:$0xff]  ;;  %v1625_v26 = vld [vmem:[%s2047_s9 + $0x20] sm:$0xff] }
  0xa7   : > { %vm633_vm12 = vmor %vm631_vm11, %vm632_vm9 }
  0xa8   : > { %v618_v36 = vmul.f32 0.5, %v617_v27  ;;  %v627_v37 = vmul.f32 %v1666_v25, %v626_v28  ;;  %v579_v38 = vsel %vm578_vm6, %v1662_v17, %v575_v32  ;;  %v1654_v28 = vld [vmem:[%s2044_s6] ss:$0 sm:$0xff] }
  0xa9   : > { %v582_v42 = vmul.f32 %v579_v38, %v556_v33  ;;  %v583_v43 = vmul.f32 %v579_v38, %v557_v35  ;;  %990 = vmatpush.bf16.msrb.mxu0 %v1617_v60  ;;  %1081 = vmatpush.bf16.msrb.mxu1 %v1627_v24  ;;  %v1622_v38 = vld [vmem:[%s2047_s9 + $0x8] sm:$0xff] }
  0xaa   : > { %v619_v41 = vsub.f32 1.5, %v618_v36  ;;  %v628_v0 = vmul.f32 0.5, %v627_v37  ;;  %913 = vmatpush.bf16.msra.mxu3 %v1605_v56  ;;  %v1624_v36 = vld [vmem:[%s2047_s9 + $0x18] sm:$0xff]  ;;  %v1623_v37 = vld [vmem:[%s2047_s9 + $0x10] sm:$0xff]  ;;  %v1656_v56 = vld [vmem:[%s2048_s10] ss:$0 sm:$0xff] }
  0xab   : > { %v637_v34 = vpack.c.bf16 %v582_v42, %v580_v39  ;;  %v638_v44 = vpack.c.bf16 %v583_v43, %v581_v40  ;;  %v1621_v39 = vld [vmem:[%s2047_s9] sm:$0xff]  ;;  %v1636_v40 = vld [vmem:[%s2049_s11 + $0x38] sm:$0xff] }
  0xac   : > { %v629_v1 = vsub.f32 1.5, %v628_v0  ;;  %v620_v7 = vmul.f32 %v1664_v22, %v619_v41  ;;  %1161 = vmatpush.bf16.msrb.mxu2 %v1636_v40  ;;  %v1635_v41 = vld [vmem:[%s2049_s11 + $0x30] sm:$0xff]  ;;  %v1634_v0 = vld [vmem:[%s2049_s11 + $0x28] sm:$0xff]  ;;  %v1633_v42 = vld [vmem:[%s2049_s11 + $0x20] sm:$0xff] }
  0xad   : > { %809 = vmatmul.bf16.vlgmr.msra.gmra.mxu1 %v637_v34  ;;  %823 = vmatmul.bf16.vlgmr.msra.gmra.mxu2 %v638_v44  ;;  %v1655_v34 = vld [vmem:[%s2046_s8] ss:$0 sm:$0xff] }
  0xae   : > { %v624_v8 = vsel %vm623_vm10, %v1664_v22, %v620_v7  ;;  %v630_v45 = vmul.f32 %v1666_v25, %v629_v1  ;;  %991 = vmatpush.bf16.msrb.mxu0 %v1616_v19  ;;  %v1613_v22 = vld [vmem:[%s2045_s7] sm:$0xff]  ;;  %1254 = vmatpush.bf16.msrb.mxu3 %v1644_v55 }
  0xaf   : > { %v635_v49 = vmul.f32 %v624_v8, %v611_v46  ;;  %v1658_v19 = vld [vmem:[%s2052_s14] ss:$0 sm:$0xff] }
  0xb0   : > { %v634_v48 = vsel %vm633_vm12, %v1666_v25, %v630_v45  ;;  %v1626_v25 = vld [vmem:[%s2047_s9 + $0x28] sm:$0xff]  ;;  %1162 = vmatpush.bf16.msrb.mxu2 %v1635_v41 }
  0xb1   : > { %v636_v50 = vmul.f32 %v634_v48, %v612_v47  ;;  %1082 = vmatpush.bf16.msrb.mxu1 %v1626_v25 }
  0xb2   : > { %992 = vmatpush.bf16.msrb.mxu0 %v1615_v20  ;;  %1255 = vmatpush.bf16.msrb.mxu3 %v1643_v2 }
  0xb3   : > { %v671_v51 = vpack.c.bf16 %v636_v50, %v635_v49  ;;  %v1632_v49 = vld [vmem:[%s2049_s11 + $0x18] sm:$0xff]  ;;  %v1631_v50 = vld [vmem:[%s2049_s11 + $0x10] sm:$0xff] }
  0xb4   : > { %1163 = vmatpush.bf16.msrb.mxu2 %v1634_v0 }
  0xb5   : > { %1359 = vmatmul.msk.bf16.vlgmr.msra.gmra.mxu0 %vm586_vm0, %v671_v51  ;;  %1083 = vmatpush.bf16.msrb.mxu1 %v1625_v26  ;;  %v1630_v51 = vld [vmem:[%s2049_s11 + $0x8] sm:$0xff] }
  0xb6   : > { %993 = vmatpush.bf16.msrb.mxu0 %v1614_v21  ;;  %1256 = vmatpush.bf16.msrb.mxu3 %v1642_v10 }
  0xb8   : > { %1164 = vmatpush.bf16.msrb.mxu2 %v1633_v42 }
  0xb9   : > { %1084 = vmatpush.bf16.msrb.mxu1 %v1624_v36 }
  0xba   : > { %994 = vmatpush.bf16.msrb.mxu0 %v1613_v22  ;;  %1257 = vmatpush.bf16.msrb.mxu3 %v1641_v53 }
  0xbc   : > { %1165 = vmatpush.bf16.msrb.mxu2 %v1632_v49 }
  0xbd   : > { %1085 = vmatpush.bf16.msrb.mxu1 %v1623_v37 }
  0xc0   : > { %1166 = vmatpush.bf16.msrb.mxu2 %v1631_v50 }
  0xc1   : > { %1086 = vmatpush.bf16.msrb.mxu1 %v1622_v38 }
  0xc4   : > { %1167 = vmatpush.bf16.msrb.mxu2 %v1630_v51 }
  0xc5   : > { %1087 = vmatpush.bf16.msrb.mxu1 %v1621_v39 }
  0xc8   : > { %1168 = vmatpush.bf16.msrb.mxu2 %v1629_v52 }
 0x12a   : > { %v810_v61 = vpop.f32.mrf.mxu1 }
 0x130   : > { %v824_v62 = vpop.f32.mrf.mxu2 }
 0x132   : > { %v700_v63 = vpop.f32.mrf.mxu0  ;;  %v812_v6 = vpop.f32.mrf.mxu1 }
 0x133   : > { %v811_v3 = vadd.f32 %v810_v61, %v700_v63  ;;  %v1640_v63 = vld [vmem:[%s2051_s13 + $0x18] sm:$0xff] }
 0x134   : > { %1258 = vmatpush.bf16.msrb.mxu3 %v1640_v63 }
 0x135   : > { %v825_v4 = vadd.f32 %v824_v62, %v811_v3  ;;  %v1639_v3 = vld [vmem:[%s2051_s13 + $0x10] sm:$0xff] }
 0x137   : > { %v833_v14 = vadd.f32 %v1653_v5, %v825_v4  ;;  %v1638_v4 = vld [vmem:[%s2051_s13 + $0x8] sm:$0xff] }
 0x138   : > { %v826_v12 = vpop.f32.mrf.mxu2  ;;  %1259 = vmatpush.bf16.msrb.mxu3 %v1639_v3 }
 0x139   : > { %v835_v16 = vmax.f32 %v833_v14, 0.0 }
 0x13a   : > { %v702_v9 = vpop.f32.mrf.mxu0 }
 0x13b   : > { %v813_v11 = vadd.f32 %v812_v6, %v702_v9 }
 0x13c   : > { %1260 = vmatpush.bf16.msrb.mxu3 %v1638_v4 }
 0x13d   : > { %v827_v13 = vadd.f32 %v826_v12, %v813_v11  ;;  %v1657_v11 = vld [vmem:[%s2050_s12] ss:$0 sm:$0xff] }
 0x13f   : > { %v834_v15 = vadd.f32 %v1653_v5, %v827_v13  ;;  %v1637_v5 = vld [vmem:[%s2051_s13] sm:$0xff] }
 0x140   : > { %1261 = vmatpush.bf16.msrb.mxu3 %v1637_v5 }
 0x141   : > { %v836_v17 = vmax.f32 %v834_v15, 0.0 }
 0x143   : > { %v837_v18 = vpack.c.bf16 %v836_v17, %v835_v16 }
 0x145   : > { %914 = vmatmul.bf16.vlgmr.msra.gmra.mxu3 %v837_v18 }
 0x1c8   : > { %v915_v27 = vpop.f32.mrf.mxu3 }
 0x1c9   : > { %v916_v29 = vadd.f32 %v1654_v28, %v915_v27 }
 0x1cb   : > { %v920_v32 = vmax.f32 %v916_v29, 0.0 }
 0x1d0   : > { %v917_v30 = vpop.f32.mrf.mxu3 }
 0x1d1   : > { %v918_v31 = vadd.f32 %v1654_v28, %v917_v30 }
 0x1d3   : > { %v921_v33 = vmax.f32 %v918_v31, 0.0 }
 0x1d5   : > { %v922_v35 = vpack.c.bf16 %v921_v33, %v920_v32 }
 0x1d7   : > { %995 = vmatmul.bf16.vlgmr.msrb.gmra.mxu0 %v922_v35 }
 0x254   : > { %v996_v43 = vpop.f32.mrf.mxu0 }
 0x255   : > { %v1001_v1 = vadd.f32 %v996_v43, %v835_v16 }
 0x257   : > { %v1007_v7 = vadd.f32 %v1655_v34, %v1001_v1 }
 0x259   : > { %v1009_v46 = vmax.f32 %v1007_v7, 0.0 }
 0x25c   : > { %v998_v44 = vpop.f32.mrf.mxu0 }
 0x25d   : > { %v1002_v8 = vadd.f32 %v998_v44, %v836_v17 }
 0x25f   : > { %v1008_v45 = vadd.f32 %v1655_v34, %v1002_v8 }
 0x261   : > { %v1010_v47 = vmax.f32 %v1008_v45, 0.0 }
 0x263   : > { %v1011_v48 = vpack.c.bf16 %v1010_v47, %v1009_v46 }
 0x265   : > { %1088 = vmatmul.bf16.vlgmr.msrb.gmra.mxu1 %v1011_v48 }
 0x2e2   : > { %v1089_v54 = vpop.f32.mrf.mxu1 }
 0x2e3   : > { %v1090_v57 = vadd.f32 %v1656_v56, %v1089_v54 }
 0x2e5   : > { %v1094_v60 = vmax.f32 %v1090_v57, 0.0 }
 0x2ea   : > { %v1091_v58 = vpop.f32.mrf.mxu1 }
 0x2eb   : > { %v1092_v59 = vadd.f32 %v1656_v56, %v1091_v58 }
 0x2ed   : > { %v1095_v61 = vmax.f32 %v1092_v59, 0.0 }
 0x2ef   : > { %v1096_v62 = vpack.c.bf16 %v1095_v61, %v1094_v60 }
 0x2f1   : > { %1169 = vmatmul.bf16.vlgmr.msrb.gmra.mxu2 %v1096_v62 }
 0x374   : > { %v1170_v6 = vpop.f32.mrf.mxu2 }
 0x375   : > { %v1175_v9 = vadd.f32 %v1170_v6, %v1009_v46 }
 0x377   : > { %v1181_v13 = vadd.f32 %v1657_v11, %v1175_v9 }
 0x379   : > { %v1183_v16 = vmax.f32 %v1181_v13, 0.0 }
 0x37c   : > { %v1172_v12 = vpop.f32.mrf.mxu2 }
 0x37d   : > { %v1176_v14 = vadd.f32 %v1172_v12, %v1010_v47 }
 0x37f   : > { %v1182_v15 = vadd.f32 %v1657_v11, %v1176_v14 }
 0x381   : > { %v1184_v17 = vmax.f32 %v1182_v15, 0.0 }
 0x383   : > { %v1185_v18 = vpack.c.bf16 %v1184_v17, %v1183_v16 }
 0x385   : > { %1262 = vmatmul.bf16.vlgmr.msrb.gmra.mxu3 %v1185_v18 }
 0x408   : > { %v1263_v20 = vpop.f32.mrf.mxu3 }
 0x409   : > { %v1264_v21 = vadd.f32 %v1658_v19, %v1263_v20 }
 0x40b   : > { %1269 = vst.msk [vmem:[%s521_s27] sm:$0xff] %vm1268_vm13, %v1264_v21 }
 0x410   : > { %v1265_v22 = vpop.f32.mrf.mxu3 }
 0x411   : > { %v1266_v23 = vadd.f32 %v1658_v19, %v1265_v22 }
 0x413   : > { %1270 = vst.msk [vmem:[%s521_s27 + $0x8] sm:$0xff] %vm1268_vm13, %v1266_v23 }
 0x414 PF: > { %s25_s18 = sadd.s32 1, %s1673_s18  }
 0x415   : > { %p22_p4 = scmp.ge.s32.totalorder %s25_s18, 4  }
 0x417   :  { %24 = sbr.rel (!%p22_p4) target bundleno = 1 (0x1), region = 113 }

</bundles_post_ra>
